<compile_context>
chip_gen: v7x
topology: tpu7x:2x2x1
jax: 0.10.0
libtpu: 0.0.40
codegen_flags: <defaults>
</compile_context>

<pallas_src>
import jax
import jax.numpy as jnp
from jax import lax
from jax.experimental import pallas as pl
from jax.experimental.pallas import tpu as pltpu


def _circconv_kernel(x_ref, w_ref, b_ref, o_ref, *, n_adj, n_pts):
    # x_ref: (C_in, N)       -- one batch element (batch dim squeezed by BlockSpec)
    # w_ref: (C_out, K*C_in) -- column order c = k*C_in + i (set up by wrapper)
    # b_ref: (C_out, 1)
    # o_ref: (C_out, N)
    k_size = 2 * n_adj + 1
    x = x_ref[...]                               # (C_in, N)
    w = w_ref[...]                               # (C_out, K*C_in)
    bias = b_ref[...].astype(jnp.float32)        # (C_out, 1)

    # tap_k[i, n] = x[i, (n + k - n_adj) mod N]  ==  roll(x, n_adj - k) along lanes.
    # pltpu.roll runs on the XLU, so no lane-relayout traffic on the vld/vst path.
    taps = [
        x if k == n_adj
        else pltpu.roll(x, shift=(n_adj - k) % n_pts, axis=1)
        for k in range(k_size)
    ]
    slab = jnp.concatenate(taps, axis=0)         # (K*C_in, N) -- sublane-axis concat

    # One MXU matmul per batch step, f32 accumulation; single lane-dense store.
    y = jnp.dot(w, slab, preferred_element_type=jnp.float32) + bias   # (C_out, N)
    o_ref[...] = y.astype(o_ref.dtype)


def circ_conv(x, weight, bias, n_adj):
    """x: (B, C_in, N) f32, weight: (C_out, C_in, 2*n_adj+1), bias: (C_out,)."""
    B, C_in, N = x.shape
    C_out, C_in_w, K = weight.shape
    assert K == 2 * n_adj + 1
    assert C_in_w == C_in
    # Circular-shift semantics only match torch's cat-based padding for n_adj <= N.
    assert 0 < n_adj <= N, "CircConv kernel requires n_adj <= number of points"

    # Wrapper-side layout plumbing (once, outside the kernel): flatten weight to
    # (C_out, K*C_in) with column order c = k*C_in + i; give the bias a lane dim.
    w_flat = jnp.transpose(weight, (0, 2, 1)).reshape(C_out, K * C_in)
    bias2d = bias.reshape(C_out, 1)

    kernel = lambda x_ref, w_ref, b_ref, o_ref: _circconv_kernel(
        x_ref, w_ref, b_ref, o_ref, n_adj=n_adj, n_pts=N
    )

    return pl.pallas_call(
        kernel,
        out_shape=jax.ShapeDtypeStruct((B, C_out, N), x.dtype),
        grid_spec=pltpu.PrefetchScalarGridSpec(
            num_scalar_prefetch=0,
            grid=(B,),  # batch axis; "parallel" lets v7x shard it over 2 TCs
            in_specs=[
                pl.BlockSpec((None, C_in, N), lambda b: (b, 0, 0)),
                pl.BlockSpec((C_out, K * C_in), lambda b: (0, 0)),
                pl.BlockSpec((C_out, 1), lambda b: (0, 0)),
            ],
            out_specs=pl.BlockSpec((None, C_out, N), lambda b: (b, 0, 0)),
        ),
        compiler_params=pltpu.CompilerParams(
            dimension_semantics=("parallel",),
        ),
    )(x, w_flat, bias2d)


def circ_conv_reference(x, weight, bias, n_adj):
    """Pure-JAX reference mirroring the PyTorch module."""
    x_pad = jnp.concatenate([x[..., -n_adj:], x, x[..., :n_adj]], axis=2)
    y = lax.conv_general_dilated(
        x_pad, weight,
        window_strides=(1,), padding="VALID",
        dimension_numbers=("NCH", "OIH", "NCH"),
    )
    return y + bias.reshape(1, -1, 1)


if __name__ == "__main__":
    # Deep-snake style config: 128-point contour (lane-aligned), small channel
    # counts, kernel_size = 2*n_adj + 1 = 9.
    B, state_dim, out_state_dim, n_adj, N = 2, 4, 4, 4, 128
    K = 2 * n_adj + 1

    key = jax.random.PRNGKey(0)
    kx, kw, kb = jax.random.split(key, 3)
    x = jax.random.normal(kx, (B, state_dim, N), dtype=jnp.float32)
    # Deterministic synthetic Conv1d parameters (PyTorch shapes: (C_out, C_in, K), (C_out,)).
    weight = jax.random.normal(kw, (out_state_dim, state_dim, K), dtype=jnp.float32) * 0.1
    bias = jax.random.normal(kb, (out_state_dim,), dtype=jnp.float32) * 0.1

    # `adj` argument of the PyTorch forward is unused by the computation; omitted here.
    y = circ_conv(x, weight, bias, n_adj)
    y = jax.block_until_ready(y)

    y_ref = circ_conv_reference(x, weight, bias, n_adj)
    assert y.shape == (B, out_state_dim, N)
    assert jnp.allclose(y, y_ref, atol=1e-4, rtol=1e-4), "mismatch vs reference conv"

    print("KERNEL_OK")
</pallas_src>

<mosaic_0001>
module attributes {stable_mosaic.version = 11 : i64} {
  func.func @_lambda_(%arg0: i32, %arg1: memref<1x4x128xf32, #tpu.memory_space<vmem>>, %arg2: memref<4x36xf32, #tpu.memory_space<vmem>>, %arg3: memref<4x1xf32, #tpu.memory_space<vmem>>, %arg4: memref<1x4x128xf32, #tpu.memory_space<vmem>>) attributes {dimension_semantics = [#tpu.dimension_semantics<parallel>], iteration_bounds = array<i64: 2>, scalar_prefetch = 0 : i64, scratch_operands = 0 : i64, tpu.core_type = #tpu.core_type<tc>, window_params = [{transform_indices = @transform_0, window_bounds = array<i64: 1, 4, 128>}, {pipeline_mode = #tpu.pipeline_mode<synchronous>, transform_indices = @transform_1, window_bounds = array<i64: 4, 36>}, {pipeline_mode = #tpu.pipeline_mode<synchronous>, transform_indices = @transform_2, window_bounds = array<i64: 4, 1>}, {transform_indices = @transform_3, window_bounds = array<i64: 1, 4, 128>}]} {
    %c0 = arith.constant 0 : index
    %c0_0 = arith.constant 0 : index
    %c0_1 = arith.constant 0 : index
    %0 = vector.load %arg1[%c0, %c0_0, %c0_1] : memref<1x4x128xf32, #tpu.memory_space<vmem>>, vector<1x4x128xf32>
    %1 = vector.shape_cast %0 : vector<1x4x128xf32> to vector<4x128xf32>
    %c0_2 = arith.constant 0 : index
    %c0_3 = arith.constant 0 : index
    %2 = vector.load %arg2[%c0_2, %c0_3] : memref<4x36xf32, #tpu.memory_space<vmem>>, vector<4x36xf32>
    %c0_4 = arith.constant 0 : index
    %c0_5 = arith.constant 0 : index
    %3 = vector.load %arg3[%c0_4, %c0_5] : memref<4x1xf32, #tpu.memory_space<vmem>>, vector<4x1xf32>
    %c4_i32 = arith.constant 4 : i32
    %4 = tpu.dynamic_rotate %1 by %c4_i32 dim 1 : vector<4x128xf32>, i32 -> vector<4x128xf32>
    %c3_i32 = arith.constant 3 : i32
    %5 = tpu.dynamic_rotate %1 by %c3_i32 dim 1 : vector<4x128xf32>, i32 -> vector<4x128xf32>
    %c2_i32 = arith.constant 2 : i32
    %6 = tpu.dynamic_rotate %1 by %c2_i32 dim 1 : vector<4x128xf32>, i32 -> vector<4x128xf32>
    %c1_i32 = arith.constant 1 : i32
    %7 = tpu.dynamic_rotate %1 by %c1_i32 dim 1 : vector<4x128xf32>, i32 -> vector<4x128xf32>
    %c127_i32 = arith.constant 127 : i32
    %8 = tpu.dynamic_rotate %1 by %c127_i32 dim 1 : vector<4x128xf32>, i32 -> vector<4x128xf32>
    %c126_i32 = arith.constant 126 : i32
    %9 = tpu.dynamic_rotate %1 by %c126_i32 dim 1 : vector<4x128xf32>, i32 -> vector<4x128xf32>
    %c125_i32 = arith.constant 125 : i32
    %10 = tpu.dynamic_rotate %1 by %c125_i32 dim 1 : vector<4x128xf32>, i32 -> vector<4x128xf32>
    %c124_i32 = arith.constant 124 : i32
    %11 = tpu.dynamic_rotate %1 by %c124_i32 dim 1 : vector<4x128xf32>, i32 -> vector<4x128xf32>
    %12 = tpu.concatenate %4, %5, %6, %7, %1, %8, %9, %10, %11 in 0 : vector<4x128xf32>, vector<4x128xf32>, vector<4x128xf32>, vector<4x128xf32>, vector<4x128xf32>, vector<4x128xf32>, vector<4x128xf32>, vector<4x128xf32>, vector<4x128xf32> -> vector<36x128xf32>
    %cst = arith.constant dense<0.000000e+00> : vector<4x128xf32>
    %13 = tpu.matmul %2, %12, %cst {dimension_numbers = #tpu.dot_dimension_numbers<[1], [0], [0], [1], [0, 0, 1, 1], [], []>} : vector<4x36xf32>, vector<36x128xf32>, vector<4x128xf32> -> vector<4x128xf32>
    %14 = vector.broadcast %3 : vector<4x1xf32> to vector<4x128xf32>
    %15 = arith.addf %13, %14 : vector<4x128xf32>
    %c0_6 = arith.constant 0 : index
    %c0_7 = arith.constant 0 : index
    %c0_8 = arith.constant 0 : index
    %16 = vector.load %arg4[%c0_6, %c0_7, %c0_8] : memref<1x4x128xf32, #tpu.memory_space<vmem>>, vector<1x4x128xf32>
    %17 = vector.shape_cast %16 : vector<1x4x128xf32> to vector<4x128xf32>
    %18 = vector.shape_cast %15 : vector<4x128xf32> to vector<1x4x128xf32>
    tpu.vector_store %arg4[%c0_6, %c0_7, %c0_8], %18 {strides = array<i32>} : memref<1x4x128xf32, #tpu.memory_space<vmem>>, vector<1x4x128xf32>,
    return
  }
  func.func @transform_0(%arg0: i32) -> (i32, i32, i32) {
    %c0_i32 = arith.constant 0 : i32
    %c0_i32_0 = arith.constant 0 : i32
    %c0_i32_1 = arith.constant 0 : i32
    return %arg0, %c0_i32, %c0_i32_0 : i32, i32, i32
  }
  func.func @transform_1(%arg0: i32) -> (i32, i32) {
    %c0_i32 = arith.constant 0 : i32
    %c0_i32_0 = arith.constant 0 : i32
    %c0_i32_1 = arith.constant 0 : i32
    return %c0_i32, %c0_i32_0 : i32, i32
  }
  func.func @transform_2(%arg0: i32) -> (i32, i32) {
    %c0_i32 = arith.constant 0 : i32
    %c0_i32_0 = arith.constant 0 : i32
    %c0_i32_1 = arith.constant 0 : i32
    return %c0_i32, %c0_i32_0 : i32, i32
  }
  func.func @transform_3(%arg0: i32) -> (i32, i32, i32) {
    %c0_i32 = arith.constant 0 : i32
    %c0_i32_0 = arith.constant 0 : i32
    %c0_i32_1 = arith.constant 0 : i32
    return %arg0, %c0_i32, %c0_i32_0 : i32, i32, i32
  }
}

</mosaic_0001>

<bundles_post_ra>
// kernel: tpu_custom_call.1
= control target key start
LH: loop header
LB: loop body
LE: loop exit
PB: predicated region body
PF: predicated region fallthrough
CT: control target
= control target key end

     0   :  { %8 = vsyncpa [#allocation3], 0  ;;  %s795_s0 = inlined_call_operand.hbm [shape: f32[2,4,128], index: 0, kind: input, shape index: {}]   ;;  %s796_s1 = inlined_call_operand.vmem [shape: f32[4,36], index: 1, kind: input, shape index: {}]   ;;  %s797_s2 = inlined_call_operand.vmem [shape: f32[4,1], index: 2, kind: input, shape index: {}]   ;;  %s798_s3 = inlined_call_operand.hbm [shape: f32[2,4,128], index: 3, kind: output, shape index: {}]  }
   0x1   :  { %10 = vsyncpa [#allocation3 + $0x1], 0 }
   0x2   :  { %11 = vsyncpa [#allocation4], 0 }
   0x3   :  { %13 = vsyncpa [#allocation4 + $0x1], 0  ;;  %s619_s12 = smov 0   ;;  %s621_s13 = smov 0  }
   0x4   :  { %s623_s14 = smov 0   ;;  %s625_s15 = smov 0  }
   0x5 LB: > { %s640_s16 = sadd.s32 4294967295, %s583_s15   ;;  %s389_s17 = sadd.s32 4294967294, %s583_s15   ;;  %s583_s15 = sphi %s625_s15, %s813_s15   ;;  %s579_s14 = sphi %s623_s14, %s812_s14   ;;  %s575_s13 = sphi %s621_s13, %s811_s13   ;;  %s571_s12 = sphi %s619_s12, %s810_s12  }
   0x6   : > { %s644_s18 = sadd.s32 1, %s583_s15   ;;  %s26_s19 = sadd.s32 1, %s579_s14 }
   0x7   : > { %s23_s20 = ssub.s32 %s583_s15, %s644_s18  ;;  %p33_p0 = scmp.ne.s32.totalorder %s579_s14, %s575_s13 }
   0x8   : > { %p24_p1 = scmp.eq.s32.totalorder %s23_s20, 0  ;;  %p34_p2 = scmp.eq.s32.totalorder %s583_s15, 0 }
   0x9   : > { %p39_p3 = scmp.ne.s32.totalorder %s575_s13, %s571_s12  ;;  %p40_p4 = scmp.eq.s32.totalorder %s640_s16, 0 }
   0xa   : > { %s656_s21 = scalar_select %p24_p1, %s579_s14, %s26_s19  }
   0xb   : > { %p658_p5 = por %p34_p2, %p33_p0  ;;  %p662_p6 = por %p40_p4, %p39_p3 }
   0xc   : > { %p105_p7 = scmp.eq.s32.totalorder %s640_s16, 1  ;;  %p111_p8 = scmp.eq.s32.totalorder %s389_s17, 1 }
   0xd   : > { %p440_p10 = scmp.lt.s32.totalorder %s583_s15, 2  ;;  %s137_s26 = sand.u32 1, %s579_s14  }
   0xe   : > { %p669_p11 = por %p105_p7, %p33_p0  ;;  %p673_p12 = por %p111_p8, %p39_p3 }
   0xf   : > { %s393_s27 = sshll.u32 %s583_s15, 6  ;;  %s392_s28 = sshll.u32 %s137_s26, 2 }
  0x10   : > { %s802_s24 = scalar_select %p669_p11, 1, 0 }
  0x11   : > { %s803_s25 = scalar_select %p673_p12, 1, 0 }
  0x12   : > { %s682_s4 = scalar_lea.hbm %s795_s0, %s393_s27  ;;  %s141_s5 = scalar_lea.vmem [#allocation2], %s392_s28 }
  0x13   : > { %s148_s6 = sshll.u32 %s141_s5, 4  ;;  %p686_p13 = pnand %p440_p10, %p658_p5  ;;  %s690_s6 = int_to_ptr.vmem [resolvable:$true] %s148_s6 }
  0x14   : > { %s138_s8 = scalar_lea.sflag [#allocation3], %s137_s26  ;;  %s487_s9 = scalar_lea.hbm %s682_s4, 64 }
  0x15   : > { %p488_p2 = scmp.ne.s32.totalorder %s682_s4, %s487_s9  ;;  %p489_p3 = pneg %p686_p13 }
  0x16   : > { %s492_s17 = scalar_lea.hbm %s795_s0, 128  ;;  %p493_p5 = scmp.lt.u32.totalorder %s682_s4, %s795_s0 }
  0x17   : > { %p490_p4 = pnand %p489_p3, %p488_p2  ;;  %p494_p8 = scmp.lt.u32.totalorder %s492_s17, %s487_s9 }
  0x18   : > { %p496_p9 = scmp.lt.u32.totalorder %s487_s9, %s682_s4 }
  0x19   : > { %p491_p7 = pneg %p490_p4  ;;  %p495_p10 = por %p494_p8, %p493_p5 }
  0x1b   : > { %p497_p0 = por %p496_p9, %p495_p10 }
  0x1d   : > { %p498_p1 = pnand %p497_p0, %p491_p7 }
  0x1f   : > { %501 = shalt.err (!%p498_p1)
}
  0x20   : > { %s502_s22 = scalar_lea.vmem %s690_s6, 64  ;;  %s585_s26 = smov [#allocation2]  }
  0x21   : > { %p503_p2 = scmp.ne.s32.totalorder %s690_s6, %s502_s22  ;;  %s507_s27 = sshll.u32 %s585_s26, 4  ;;  %s508_s27 = int_to_ptr.vmem [resolvable:$false] %s507_s27 }
  0x22   : > { %s509_s28 = scalar_lea.vmem %s508_s27, 128  ;;  %p510_p11 = scmp.lt.s32.totalorder %s690_s6, %s508_s27 }
  0x23   : > { %p505_p4 = pnand %p503_p2, %p489_p3  ;;  %p511_p5 = scmp.lt.s32.totalorder %s509_s28, %s502_s22 }
  0x25   : > { %p506_p12 = pneg %p505_p4  ;;  %p512_p8 = por %p511_p5, %p510_p11 }
  0x27   : > { %p513_p9 = pnand %p512_p8, %p506_p12 }
  0x29   : > { %516 = shalt.err (!%p513_p9)
}
  0x2a   : > { %435 = dma.hbm_to_vmem [thread:$0]  (!%p686_p13), %s682_s4, 64, %s690_s6, %s138_s8  }
  0x2b   : > { %p805_p0 = scmp.lt.s32.totalorder %s583_s15, 3  ;;  %p806_p1 = scmp.ge.s32.totalorder %s583_s15, 1 }
  0x2d   : > { %p154_p3 = pnand %p806_p1, %p805_p0 }
  0x2e   : > { %s724_s29 = sand.u32 (!%p154_p3), 1, %s575_s13  }
  0x2f   : > { %157 = sbr.rel (%p154_p3) target bundleno = 419 (0x1a3), region = 32  ;;  %s395_s30 = sshll.u32 (!%p154_p3), %s724_s29, 2 }
  0x30   : > { %s160_s5 = scalar_lea.sflag (!%p154_p3), [#allocation3], %s724_s29  ;;  %s163_s7 = scalar_lea.vmem (!%p154_p3), [#allocation2], %s395_s30 }
  0x36   : > { %562 = dma.done.wait (%p662_p6), %s160_s5, 64  }
  0x37   : > { %564 = vsyncadd (%p662_p6), %s160_s5, 4294967232  ;;  %v586_v0 = vmov 0.0|0.0   ;;  %v186_v1 = vld [vmem:[%s163_s7] sm:$0xf]  ;;  %s587_s4 = smov 3   ;;  %s588_s6 = smov 4  }
  0x38   : > { %422 = vmatprep.subr.bf16.mxu0 %v586_v0  ;;  %191 = vrot.lane.b32.xlu0 %v186_v1, %s587_s4  ;;  %s589_s8 = smov 1   ;;  %s590_s9 = smov 2   ;;  %vm591_vm0 = vmmov 0   ;;  %v592_v2 = vmov 0.0   ;;  %v595_v3 = vmov 0   ;;  %vm217_vm1 = vcmask 1043456  }
  0x39   : > { %189 = vrot.lane.b32.xlu1 %v186_v1, %s588_s6  ;;  %419 = vmatprep.mubr.msk.f32.mxu0 %vm591_vm0, %v592_v2  ;;  %s593_s10 = smov 127   ;;  %s594_s11 = smov 125   ;;  %v188_v4 = vld [vmem:[%s797_s2] sm:$0xf]  ;;  %vm227_vm2 = vcmask 293888  }
  0x3a   : > { %486 = vset.pattern.permute.xlu0 %v595_v3  ;;  %s596_s23 = smov 126   ;;  %s597_s17 = smov 124   ;;  %v187_v23 = vld [vmem:[%s796_s1] sm:$0xf] }
  0x3b   : > { %s400_s27 = sshll.u32 %s640_s16, 6  ;;  %s185_s28 = scalar_lea.vmem [#allocation5], %s395_s30 }
  0x3c   : > { %195 = vrot.lane.b32.xlu0 %v186_v1, %s589_s8  ;;  %s319_s5 = sshll.u32 %s185_s28, 4  ;;  %s751_s6 = scalar_lea.hbm %s798_s3, %s400_s27  ;;  %s753_s5 = int_to_ptr.vmem [resolvable:$true] %s319_s5 }
  0x3d   : > { %193 = vrot.lane.b32.xlu1 %v186_v1, %s590_s9  ;;  %s306_s8 = scalar_lea.sflag [#allocation4], %s724_s29  ;;  %s517_s9 = scalar_lea.vmem %s753_s5, 64 }
  0x3e   : > { %p518_p6 = scmp.ne.s32.totalorder %s753_s5, %s517_s9  ;;  %p807_p11 = scmp.ne.s32.totalorder %s802_s24, 0 }
  0x3f   : > { %s598_s16 = smov [#allocation5]  }
  0x40   : > { %197 = vrot.lane.b32.xlu0 %v186_v1, %s593_s10  ;;  %p519_p12 = pnand %p518_p6, %p807_p11  ;;  %s521_s30 = sshll.u32 %s598_s16, 4  ;;  %s522_s30 = int_to_ptr.vmem [resolvable:$false] %s521_s30 }
  0x41   : > { %201 = vrot.lane.b32.xlu1 %v186_v1, %s594_s11  ;;  %s523_s10 = scalar_lea.vmem %s522_s30, 128  ;;  %p524_p7 = scmp.lt.s32.totalorder %s753_s5, %s522_s30 }
  0x42   : > { %p520_p13 = pneg %p519_p12  ;;  %p525_p10 = scmp.lt.s32.totalorder %s523_s10, %s517_s9 }
  0x44   : > { %199 = vrot.lane.b32.xlu0 %v186_v1, %s596_s23  ;;  %p526_p2 = por %p525_p10, %p524_p7 }
  0x45   : > { %203 = vrot.lane.b32.xlu1 %v186_v1, %s597_s17 }
  0x46   : > { %p527_p4 = pnand %p526_p2, %p520_p13 }
  0x48   : > { %224 = vperm.xlu0 %486, %v188_v4  }
  0xaa   : > { %v192_v5 = vpop.permute.xlu0 %191 }
  0xab   : > { %v190_v6 = vpop.permute.xlu1 %189  ;;  %v206_v7 = vrot.slane %v192_v5, 4 }
  0xad   : > { %v218_v11 = vsel %vm217_vm1, %v190_v6, %v206_v7 }
  0xae   : > { %v196_v8 = vpop.permute.xlu0 %195 }
  0xaf   : > { %v194_v9 = vpop.permute.xlu1 %193  ;;  %v209_v10 = vrot.slane %v196_v8, 4 }
  0xb1   : > { %v219_v12 = vsel %vm217_vm1, %v194_v9, %v209_v10 }
  0xb2   : > { %v198_v13 = vpop.permute.xlu0 %197  ;;  %v423_v15 = vpack.c.bf16 %v219_v12, %v218_v11 }
  0xb3   : > { %v202_v14 = vpop.permute.xlu1 %201  ;;  %v212_v16 = vrot.slane %v198_v13, 4 }
  0xb4   : > { %v215_v17 = vrot.slane %v202_v14, 4  ;;  %424 = vmatpush3.bf16.msra.mxu0 %v423_v15 }
  0xb5   : > { %425 = vmatprep.subr.bf16.mxu0 %v586_v0  ;;  %v220_v19 = vsel %vm217_vm1, %v186_v1, %v212_v16 }
  0xb6   : > { %v200_v18 = vpop.permute.xlu0 %199 }
  0xb7   : > { %v221_v20 = vsel %vm217_vm1, %v200_v18, %v215_v17  ;;  %v204_v22 = vpop.permute.xlu1 %203 }
  0xb8   : > { %v426_v21 = vpack.c.bf16 %v221_v20, %v220_v19 }
  0xba   : > { %427 = vmatpush3.bf16.msra.mxu0 %v426_v21 }
  0xbb   : > { %417 = vmatprep.subr.mxu0 %v592_v2 }
  0xbe   : > { %418 = vmatpush3.msk.msra.mxu0 %vm217_vm1, %v204_v22 }
  0xbf   : > { %420 = vmatmul.mubr.msk.f32.vlgmr.msra.gmra.mrb[0].mxu0 %vm227_vm2, %v187_v23 }
  0xc7   : > { %v225_v24 = vpop.permute.xlu0 %224 }
 0x192   : > { %v300_v25 = vpop.f32.mrb[0].mxu0 }
 0x193   : > { %v301_v26 = vadd.f32 %v300_v25, %v225_v24  ;;  %v421_v27 = vpop.f32.mrb[1].mxu0 }
 0x195   : > { %304 = vst [vmem:[%s185_s28] sm:$0xf] %v301_v26 }
 0x196   : > { %530 = shalt.err (!%p527_p4)
}
 0x197   : > { %s531_s29 = scalar_lea.hbm %s751_s6, 64  ;;  %s535_s17 = scalar_lea.hbm %s798_s3, 128 }
 0x198   : > { %p532_p5 = scmp.ne.s32.totalorder %s751_s6, %s531_s29  ;;  %p536_p0 = scmp.lt.u32.totalorder %s751_s6, %s798_s3 }
 0x199   : > { %p537_p1 = scmp.lt.u32.totalorder %s535_s17, %s531_s29  ;;  %p539_p6 = scmp.lt.u32.totalorder %s531_s29, %s751_s6 }
 0x19a   : > { %p533_p8 = pnand %p532_p5, %p807_p11 }
 0x19b   : > { %p538_p3 = por %p537_p1, %p536_p0 }
 0x19c   : > { %p534_p9 = pneg %p533_p8 }
 0x19d   : > { %p540_p12 = por %p539_p6, %p538_p3 }
 0x19f   : > { %p541_p13 = pnand %p540_p12, %p534_p9 }
 0x1a1   : > { %544 = shalt.err (!%p541_p13)
}
 0x1a2   : > { %430 = dma.vmem_to_hbm [thread:$0]  (%p807_p11), %s753_s5, 64, %s751_s6, %s306_s8  }
 0x1a3 PF: > { %s331_s22 = sand.u32 1, %s571_s12   ;;  %p808_p7 = scmp.ne.s32.totalorder %s803_s25, 0 }
 0x1a4   : > { %p809_p10 = scmp.ge.s32.totalorder %s583_s15, 2  ;;  %s332_s26 = scalar_lea.sflag [#allocation4], %s331_s22 }
 0x1a6   : > { %p437_p2 = pnand %p809_p10, %p808_p7 }
 0x1a8   : > { %566 = dma.done.wait (!%p437_p2), %s332_s26, 64  }
 0x1a9   : > { %568 = vsyncadd (!%p437_p2), %s332_s26, 4294967232  ;;  %p16_p4 = scmp.ge.s32.totalorder %s644_s18, 4   ;;  %s810_s12 = smov %s575_s13 }
 0x1aa   : > { %s811_s13 = smov %s579_s14  ;;  %s812_s14 = smov %s656_s21 }
 0x1ab   : > { %s813_s15 = smov %s644_s18  ;;  %18 = sbr.rel (!%p16_p4) target bundleno = 5 (0x5), region = 77 }
 0x1b2   :  { %337 = vsyncpa [#allocation3], 1 }
 0x1b3   :  { %339 = vsyncpa [#allocation3 + $0x1], 1 }
 0x1b4   :  { %340 = vsyncpa [#allocation4], 1 }
 0x1b5   :  { %342 = vsyncpa [#allocation4 + $0x1], 1 }

</bundles_post_ra>
